<compile_context>
chip_gen: v7x
topology: tpu7x:2x2x1
jax: 0.10.0
libtpu: 0.0.40
codegen_flags: <defaults>
</compile_context>

<pallas_src>
import functools
import math

import jax
import jax.numpy as jnp
from jax.experimental import pallas as pl
from jax.experimental.pallas import tpu as pltpu


# ----------------------------------------------------------------------------
# Kernels
# ----------------------------------------------------------------------------

def _kproj_kernel(s_ref, wk_ref, pk_ref, kx_ref):
    """kx = S @ Wk + bk, computed once (hoisted out of the Lq attention grid)."""
    B, tk, D = s_ref.shape
    bk = pk_ref[1:2, :]                                   # (1, D) f32
    s2 = s_ref[...].reshape(B * tk, D)                    # activation-dtype MXU operand
    kx = jnp.dot(s2, wk_ref[...], preferred_element_type=jnp.float32) + bk
    kx_ref[...] = kx.reshape(B, tk, D).astype(kx_ref.dtype)


def _lsattention_kernel(hidden_ref, kx_ref, wq_ref, wp_ref, pk_ref, o_ref, *, flat_out):
    B, tq, D = hidden_ref.shape         # hidden block: (B, tq, D)
    _, Lk, _ = kx_ref.shape             # kx (full):    (B, Lk, D)
    act = hidden_ref.dtype              # MXU operand dtype (native bf16 path when bf16)

    hidden = hidden_ref[...]
    kx = kx_ref[...]                    # pre-projected keys, activation dtype
    wq = wq_ref[...]
    wp = wp_ref[...]
    pk = pk_ref[...]                    # (8, D) f32 packed small params
    bq = pk[0:1, :]
    bp = pk[2:3, :]
    gamma = pk[3:4, :]
    beta = pk[4:5, :]

    # q projection: batch folded into the MXU M dim -> one dense matmul.
    h2 = hidden.reshape(B * tq, D)
    qx2 = jnp.dot(h2, wq, preferred_element_type=jnp.float32) + bq      # (B*tq, D) f32
    qx = qx2.reshape(B, tq, D).astype(act)      # back to activation dtype for the MXU

    # dot-product scores (B, tq, Lk); softmax over dim=0 (the batch axis),
    # exactly as in the PyTorch reference (n_head=1).
    score = jnp.einsum('bqd,bkd->bqk', qx, kx, preferred_element_type=jnp.float32)
    m = jnp.max(score, axis=0, keepdims=True)
    e = jnp.exp(score - m)
    denom = jnp.sum(e, axis=0, keepdims=True)
    # Exact normalization (no approx reciprocal); the scale is folded into the
    # cast of the p@kx operand so only one (B, tq, Lk) f32 temporary stays live.
    p = (e / denom).astype(act)

    # attention output + output projection (split/cat is identity for n_head=1).
    out = jnp.einsum('bqk,bkd->bqd', p, kx, preferred_element_type=jnp.float32)
    out2 = jnp.dot(out.reshape(B * tq, D).astype(act), wp,
                   preferred_element_type=jnp.float32) + bp
    # TODO(synk): training-mode dropout (p=0.5) not implemented; eval-mode identity.

    # residual + LayerNorm, two-pass mean/variance, f32 epilogue math
    # (v5e has no bf16 VPU/EUP).
    y = out2 + h2.astype(jnp.float32)                                    # (B*tq, D)
    mu = jnp.mean(y, axis=-1, keepdims=True)
    d = y - mu
    var = jnp.mean(d * d, axis=-1, keepdims=True)
    h = d * jax.lax.rsqrt(var + 1e-5) * gamma + beta

    if flat_out:
        # Lane-dense store: last dim tq*D (multiple of 128 lanes or full array)
        # instead of a 32-wide masked partial store.
        o_ref[...] = h.reshape(B, tq * D).astype(o_ref.dtype)
    else:
        o_ref[...] = h.reshape(B, tq, D).astype(o_ref.dtype)


# ----------------------------------------------------------------------------
# Wrapper
# ----------------------------------------------------------------------------

_VMEM_LIMIT = 48 * 1024 * 1024     # explicit cap: fits v7x's 64 MiB; v5e/v6e have headroom
_VMEM_BUDGET = 24 * 1024 * 1024    # conservative working-set target used to pick tq


def _pick_tq(B, Lq, Lk, D, act_bytes):
    """Largest Lq tile whose working set fits the budget (big tiles amortize the
    ~0.35us/grid-step overhead; v5e/v6e can reach 512, v7x stays bounded)."""
    def footprint(t):
        blocks = (4 * B * t * D * act_bytes              # hidden + out, double-buffered
                  + B * Lk * D * act_bytes               # kx, resident
                  + 2 * D * D * act_bytes + 8 * D * 4)   # wq, wp, packed params
        interm = 2 * B * t * Lk * 4 + 3 * B * t * D * 4  # f32 score/p + qx/out/y temps
        return blocks + interm
    tq = min(Lq, 512)
    while tq > 8 and footprint(tq) > _VMEM_BUDGET:
        tq = max(8, (tq // 2) // 8 * 8)
    return tq


def lsattention(hidden, S, params, *, tq=None, tk=None):
    """hidden: (B, Lq, D), S: (B, Lk, D) -> (B, Lq, D)."""
    B, Lq, D = hidden.shape
    _, Lk, _ = S.shape
    act = hidden.dtype
    act_bytes = jnp.dtype(act).itemsize

    # Weights travel in the activation dtype (half the DMA/VMEM for bf16 and the
    # native bf16 MXU path); the five tiny (1, D) params are packed into one
    # padded (8, D) f32 tile -> one DMA instead of five.
    wq = params['wq'].astype(act)
    wk = params['wk'].astype(act)
    wp = params['wp'].astype(act)
    packed = jnp.zeros((8, D), jnp.float32)
    packed = packed.at[0].set(params['bq'].reshape(D).astype(jnp.float32))
    packed = packed.at[1].set(params['bk'].reshape(D).astype(jnp.float32))
    packed = packed.at[2].set(params['bp'].reshape(D).astype(jnp.float32))
    packed = packed.at[3].set(params['gamma'].reshape(D).astype(jnp.float32))
    packed = packed.at[4].set(params['beta'].reshape(D).astype(jnp.float32))

    # ---- stage 1: kx = S @ Wk + bk, computed ONCE (not per Lq tile) ----------
    if tk is None:
        tk = min(Lk, 512)
    kx = pl.pallas_call(
        _kproj_kernel,
        out_shape=jax.ShapeDtypeStruct((B, Lk, D), act),
        grid=(pl.cdiv(Lk, tk),),
        in_specs=[
            pl.BlockSpec((B, tk, D), lambda i: (0, i, 0)),   # S, tiled over Lk
            pl.BlockSpec((D, D), lambda i: (0, 0)),          # wk
            pl.BlockSpec((8, D), lambda i: (0, 0)),          # packed (for bk)
        ],
        out_specs=pl.BlockSpec((B, tk, D), lambda i: (0, i, 0)),
        compiler_params=pltpu.CompilerParams(
            dimension_semantics=("parallel",),
            vmem_limit_bytes=_VMEM_LIMIT),
    )(S, wk, packed)

    # ---- stage 2: attention + residual + LayerNorm, tiled over Lq ------------
    if tq is None:
        tq = _pick_tq(B, Lq, Lk, D, act_bytes)
    grid = (pl.cdiv(Lq, tq),)

    # Lane-dense output block (B, tq*D) whenever the (8,128) rule allows it.
    flat_out = (tq == Lq) or ((tq * D) % 128 == 0)
    if flat_out:
        out_shape = jax.ShapeDtypeStruct((B, Lq * D), act)
        out_spec_args = ((B, tq * D), lambda i: (0, i))
    else:
        out_shape = jax.ShapeDtypeStruct((B, Lq, D), act)
        out_spec_args = ((B, tq, D), lambda i: (0, i, 0))
    kernel = functools.partial(_lsattention_kernel, flat_out=flat_out)

    def build(single_buffer_consts):
        # Constant-index operands (kx, wq, wp, packed) don't need the second
        # pipeline buffer; Buffered(1) halves their VMEM footprint.
        ckw = {'pipeline_mode': pl.Buffered(1)} if single_buffer_consts else {}
        return pl.pallas_call(
            kernel,
            out_shape=out_shape,
            grid=grid,
            in_specs=[
                pl.BlockSpec((B, tq, D), lambda i: (0, i, 0)),          # hidden, tiled over Lq
                pl.BlockSpec((B, Lk, D), lambda i: (0, 0, 0), **ckw),   # kx, resident
                pl.BlockSpec((D, D), lambda i: (0, 0), **ckw),          # wq
                pl.BlockSpec((D, D), lambda i: (0, 0), **ckw),          # wp
                pl.BlockSpec((8, D), lambda i: (0, 0), **ckw),          # packed biases/LN
            ],
            out_specs=pl.BlockSpec(*out_spec_args),
            compiler_params=pltpu.CompilerParams(
                # Lq tiles are independent (softmax is over batch) -> megacore
                # sharding on v7x, plain pipelining on v5e/v6e.
                dimension_semantics=("parallel",),
                vmem_limit_bytes=_VMEM_LIMIT),
        )

    # TODO(synk): for very long Lk, add an 'arbitrary' Lk grid axis with a VMEM
    # accumulator (softmax is over batch, so k-tiles are independent) to bound
    # the (B, tq, Lk) f32 intermediates on v7x's 64 MiB VMEM.
    try:
        out = build(True)(hidden, kx, wq, wp, packed)
    except Exception:
        # Fallback for JAX versions that reject pipeline_mode=pl.Buffered(1):
        # identical math, default double-buffered constants.
        out = build(False)(hidden, kx, wq, wp, packed)

    return out.reshape(B, Lq, D) if flat_out else out


# ----------------------------------------------------------------------------
# Synthetic params / pure-JAX reference / demo
# ----------------------------------------------------------------------------

def init_params(key, D):
    """Deterministic synthetic parameters mirroring the module's shapes."""
    k1, k2, k3, k4, k5, k6 = jax.random.split(key, 6)
    bound = 1.0 / math.sqrt(D)
    u = lambda k, shp: jax.random.uniform(k, shp, jnp.float32, -bound, bound)
    return {
        # w_q / w_k: Linear(D, n_head*hidden_dim) = Linear(D, D), stored (in, out)
        'wq': u(k1, (D, D)), 'bq': u(k2, (1, D)),
        'wk': u(k3, (D, D)), 'bk': u(k4, (1, D)),
        # proj: Linear(D, D)
        'wp': u(k5, (D, D)), 'bp': u(k6, (1, D)),
        # LayerNorm(D) defaults: gamma=1, beta=0
        'gamma': jnp.ones((1, D), jnp.float32),
        'beta': jnp.zeros((1, D), jnp.float32),
    }


def lsattention_ref(hidden, S, params):
    """Pure-JAX reference (einsums at Precision.HIGHEST so the comparison is not
    polluted by XLA's default reduced-precision f32 matmul path on TPU)."""
    ein = functools.partial(jnp.einsum, precision=jax.lax.Precision.HIGHEST)
    qx = ein('bqd,de->bqe', hidden, params['wq']) + params['bq']
    kx = ein('bkd,de->bke', S, params['wk']) + params['bk']
    score = ein('bqd,bkd->bqk', qx, kx)
    score = jax.nn.softmax(score, axis=0)          # dim=0 softmax, as in the reference
    out = ein('bqk,bkd->bqd', score, kx)
    out = ein('bqd,de->bqe', out, params['wp']) + params['bp']
    y = out + hidden
    mu = jnp.mean(y, axis=-1, keepdims=True)
    var = jnp.mean((y - mu) ** 2, axis=-1, keepdims=True)
    return (y - mu) / jnp.sqrt(var + 1e-5) * params['gamma'] + params['beta']


if __name__ == "__main__":
    B, Lq, Lk, D = 2, 8, 8, 32        # D_m = 32, n_head = 1
    key = jax.random.PRNGKey(0)
    k_h, k_s, k_p = jax.random.split(key, 3)
    hidden = jax.random.normal(k_h, (B, Lq, D), jnp.float32)
    S = jax.random.normal(k_s, (B, Lk, D), jnp.float32)
    params = init_params(k_p, D)

    out = jax.block_until_ready(lsattention(hidden, S, params))
    ref = jax.block_until_ready(lsattention_ref(hidden, S, params))
    assert out.shape == (B, Lq, D)
    err = float(jnp.max(jnp.abs(out - ref)))
    # Kernel softmax/LayerNorm math is exact f32 (no approx reciprocal, two-pass
    # variance), so this tolerance carries a wide margin.
    assert jnp.allclose(out, ref, atol=2e-3, rtol=2e-3), err
    print("KERNEL_OK")
</pallas_src>

<mosaic_0001>
module attributes {stable_mosaic.version = 11 : i64} {
  func.func @_kproj_kernel(%arg0: i32, %arg1: memref<2x8x32xf32, #tpu.memory_space<vmem>>, %arg2: memref<32x32xf32, #tpu.memory_space<vmem>>, %arg3: memref<8x32xf32, #tpu.memory_space<vmem>>, %arg4: memref<2x8x32xf32, #tpu.memory_space<vmem>>) attributes {dimension_semantics = [#tpu.dimension_semantics<parallel>], iteration_bounds = array<i64: 1>, scalar_prefetch = 0 : i64, scratch_operands = 0 : i64, tpu.core_type = #tpu.core_type<tc>, window_params = [{transform_indices = @transform_0, window_bounds = array<i64: 2, 8, 32>}, {pipeline_mode = #tpu.pipeline_mode<synchronous>, transform_indices = @transform_1, window_bounds = array<i64: 32, 32>}, {pipeline_mode = #tpu.pipeline_mode<synchronous>, transform_indices = @transform_2, window_bounds = array<i64: 8, 32>}, {transform_indices = @transform_3, window_bounds = array<i64: 2, 8, 32>}]} {
    %c1 = arith.constant 1 : index
    %c0 = arith.constant 0 : index
    %0 = vector.load %arg3[%c1, %c0] : memref<8x32xf32, #tpu.memory_space<vmem>>, vector<1x32xf32>
    %c0_0 = arith.constant 0 : index
    %c0_1 = arith.constant 0 : index
    %c0_2 = arith.constant 0 : index
    %1 = vector.load %arg1[%c0_0, %c0_1, %c0_2] : memref<2x8x32xf32, #tpu.memory_space<vmem>>, vector<2x8x32xf32>
    %2 = vector.shape_cast %1 : vector<2x8x32xf32> to vector<16x32xf32>
    %c0_3 = arith.constant 0 : index
    %c0_4 = arith.constant 0 : index
    %3 = vector.load %arg2[%c0_3, %c0_4] : memref<32x32xf32, #tpu.memory_space<vmem>>, vector<32x32xf32>
    %cst = arith.constant dense<0.000000e+00> : vector<16x32xf32>
    %4 = tpu.matmul %2, %3, %cst {dimension_numbers = #tpu.dot_dimension_numbers<[1], [0], [0], [1], [0, 0, 1, 1], [], []>} : vector<16x32xf32>, vector<32x32xf32>, vector<16x32xf32> -> vector<16x32xf32>
    %5 = vector.broadcast %0 : vector<1x32xf32> to vector<16x32xf32>
    %6 = arith.addf %4, %5 : vector<16x32xf32>
    %7 = vector.shape_cast %6 : vector<16x32xf32> to vector<2x8x32xf32>
    %c0_5 = arith.constant 0 : index
    %c0_6 = arith.constant 0 : index
    %c0_7 = arith.constant 0 : index
    %8 = vector.load %arg4[%c0_5, %c0_6, %c0_7] : memref<2x8x32xf32, #tpu.memory_space<vmem>>, vector<2x8x32xf32>
    tpu.vector_store %arg4[%c0_5, %c0_6, %c0_7], %7 {strides = array<i32>} : memref<2x8x32xf32, #tpu.memory_space<vmem>>, vector<2x8x32xf32>,
    return
  }
  func.func @transform_0(%arg0: i32) -> (i32, i32, i32) {
    %c0_i32 = arith.constant 0 : i32
    %c0_i32_0 = arith.constant 0 : i32
    %c0_i32_1 = arith.constant 0 : i32
    return %c0_i32, %arg0, %c0_i32_0 : i32, i32, i32
  }
  func.func @transform_1(%arg0: i32) -> (i32, i32) {
    %c0_i32 = arith.constant 0 : i32
    %c0_i32_0 = arith.constant 0 : i32
    %c0_i32_1 = arith.constant 0 : i32
    return %c0_i32, %c0_i32_0 : i32, i32
  }
  func.func @transform_2(%arg0: i32) -> (i32, i32) {
    %c0_i32 = arith.constant 0 : i32
    %c0_i32_0 = arith.constant 0 : i32
    %c0_i32_1 = arith.constant 0 : i32
    return %c0_i32, %c0_i32_0 : i32, i32
  }
  func.func @transform_3(%arg0: i32) -> (i32, i32, i32) {
    %c0_i32 = arith.constant 0 : i32
    %c0_i32_0 = arith.constant 0 : i32
    %c0_i32_1 = arith.constant 0 : i32
    return %c0_i32, %arg0, %c0_i32_0 : i32, i32, i32
  }
}

</mosaic_0001>

<bundles_post_ra>
// kernel: tpu_custom_call.1
= control target key start
LH: loop header
LB: loop body
LE: loop exit
PB: predicated region body
PF: predicated region fallthrough
CT: control target
= control target key end

     0   :  { %8 = vsyncpa [#allocation3], 0  ;;  %s389_s0 = inlined_call_operand.hbm [shape: f32[2,8,32], index: 0, kind: input, shape index: {}]   ;;  %s390_s1 = inlined_call_operand.hbm [shape: f32[32,32], index: 1, kind: input, shape index: {}]   ;;  %s391_s2 = inlined_call_operand.hbm [shape: f32[8,32], index: 2, kind: input, shape index: {}]   ;;  %s392_s3 = inlined_call_operand.hbm [shape: f32[2,8,32], index: 3, kind: output, shape index: {}]  }
   0x1   :  { %9 = vsyncpa [#allocation6], 0 }
   0x2   :  { %10 = vsyncpa [#allocation4], 0  ;;  %s295_s12 = smov [#allocation5]   ;;  %s296_s14 = smov [#allocation2]  }
   0x3   :  { %s28_s13 = sshll.u32 %s295_s12, 4  ;;  %s16_s15 = sshll.u32 %s296_s14, 4  ;;  %s29_s13 = int_to_ptr.vmem [resolvable:$true] %s28_s13  ;;  %s321_s15 = int_to_ptr.vmem [resolvable:$true] %s16_s15 }
   0x4   :  { %s201_s18 = scalar_lea.hbm %s390_s1, 512 }
   0x5   :  { %p202_p0 = scmp.ne.s32.totalorder %s390_s1, %s201_s18  ;;  %p205_p1 = scmp.lt.u32.totalorder %s201_s18, %s390_s1 }
   0x7   :  { %p207_p2 = pnand %p205_p1, %p202_p0 }
   0x9   :  { %210 = shalt.err (!%p207_p2)
}
   0xa   :  { %s211_s23 = scalar_lea.vmem %s29_s13, 512  ;;  %p216_p4 = scmp.lt.s32.totalorder %s29_s13, %s29_s13 }
   0xb   :  { %p212_p3 = scmp.ne.s32.totalorder %s29_s13, %s211_s23  ;;  %p217_p5 = scmp.lt.s32.totalorder %s211_s23, %s211_s23 }
   0xd   :  { %p218_p6 = por %p217_p5, %p216_p4 }
   0xf   :  { %p219_p7 = pnand %p218_p6, %p212_p3 }
  0x11   :  { %222 = shalt.err (!%p219_p7)
}
  0x12   :  { %s297_s24 = smov 128   ;;  %s298_s25 = smov 8  }
  0x13   :  { %34 = dma.hbm_to_vmem [thread:$0]  %s390_s1, 512, %s29_s13, [#allocation6], %s297_s24, %s297_s24, %s298_s25  }
  0x14   :  { %s223_s30 = scalar_lea.hbm %s389_s0, 256 }
  0x15   :  { %p224_p8 = scmp.ne.s32.totalorder %s389_s0, %s223_s30  ;;  %p227_p9 = scmp.lt.u32.totalorder %s223_s30, %s389_s0 }
  0x17   :  { %p229_p10 = pnand %p227_p9, %p224_p8 }
  0x19   :  { %232 = shalt.err (!%p229_p10)
}
  0x1a   :  { %s233_s8 = scalar_lea.vmem %s321_s15, 256  ;;  %p238_p12 = scmp.lt.s32.totalorder %s321_s15, %s321_s15 }
  0x1b   :  { %p234_p11 = scmp.ne.s32.totalorder %s321_s15, %s233_s8  ;;  %p239_p13 = scmp.lt.s32.totalorder %s233_s8, %s233_s8 }
  0x1d   :  { %p240_p0 = por %p239_p13, %p238_p12 }
  0x1f   :  { %p241_p1 = pnand %p240_p0, %p234_p11 }
  0x21   :  { %244 = shalt.err (!%p241_p1)
}
  0x22   :  { %22 = dma.hbm_to_vmem [thread:$0]  %s389_s0, 256, %s321_s15, [#allocation3], %s297_s24, %s297_s24, %s298_s25  }
  0x23   :  { %s299_s10 = smov [#allocation7]   ;;  %s245_s14 = scalar_lea.hbm %s391_s2, 128 }
  0x24   :  { %s41_s11 = sshll.u32 %s299_s10, 4  ;;  %p246_p2 = scmp.ne.s32.totalorder %s391_s2, %s245_s14  ;;  %s42_s11 = int_to_ptr.vmem [resolvable:$true] %s41_s11 }
  0x25   :  { %p249_p3 = scmp.lt.u32.totalorder %s245_s14, %s391_s2 }
  0x27   :  { %p251_p4 = pnand %p249_p3, %p246_p2 }
  0x29   :  { %254 = shalt.err (!%p251_p4)
}
  0x2a   :  { %s255_s20 = scalar_lea.vmem %s42_s11, 128  ;;  %p260_p6 = scmp.lt.s32.totalorder %s42_s11, %s42_s11 }
  0x2b   :  { %p256_p5 = scmp.ne.s32.totalorder %s42_s11, %s255_s20  ;;  %p261_p7 = scmp.lt.s32.totalorder %s255_s20, %s255_s20 }
  0x2d   :  { %p262_p8 = por %p261_p7, %p260_p6 }
  0x2f   :  { %p263_p9 = pnand %p262_p8, %p256_p5 }
  0x31   :  { %266 = shalt.err (!%p263_p9)
}
  0x32   :  { %44 = dma.hbm_to_vmem [thread:$0]  %s391_s2, 128, %s42_s11, [#allocation6]  }
  0x33   :  { %289 = dma.done.wait [#allocation3], 256  }
  0x34   :  { %290 = vsyncadd [#allocation3], 4294967040 }
  0x35   :  { %291 = dma.done.wait [#allocation6], 640  }
  0x36   :  { %292 = vsyncadd [#allocation6], 4294966656  ;;  %vm65_vm0 = vcmask 261120   ;;  %v57_v0 = vld [vmem:[#allocation5] sm:$0xff]  ;;  %v58_v1 = vld [vmem:[#allocation5 + $0x8] sm:$0xff]  ;;  %s300_s2 = smov [#allocation8]  }
  0x37   :  { %v59_v2 = vld [vmem:[#allocation5 + $0x10] sm:$0xff]  ;;  %v187_v3 = vpack.c.bf16 %v58_v1, %v57_v0  ;;  %v60_v4 = vld [vmem:[#allocation5 + $0x18] sm:$0xff]  ;;  %v167_v8 = vld [vmem:[#allocation7 + $0x1] ss:$0 sm:$0xff]  ;;  %s154_s21 = sshll.u32 %s300_s2, 4  ;;  %s155_s21 = int_to_ptr.vmem [resolvable:$true] %s154_s21 }
  0x38   :  { %v55_v5 = vld [vmem:[#allocation2] sm:$0xff]  ;;  %v191_v6 = vpack.c.bf16 %v60_v4, %v59_v2  ;;  %v56_v7 = vld [vmem:[#allocation2 + $0x8] sm:$0xff]  ;;  %s267_s22 = scalar_lea.vmem %s155_s21, 256  ;;  %p272_p11 = scmp.lt.s32.totalorder %s155_s21, %s155_s21 }
  0x39   :  { %184 = vmatprep.mubr.msk.f32.mxu0 %vm65_vm0, %v55_v5  ;;  %188 = vmatprep.subr.bf16.mxu0 %v187_v3  ;;  %p268_p10 = scmp.ne.s32.totalorder %s155_s21, %s267_s22  ;;  %p273_p12 = scmp.lt.s32.totalorder %s267_s22, %s267_s22 }
  0x3a   :  { %190 = vmatpush3.bf16.msra.mxu0 %v187_v3 }
  0x3b   :  { %192 = vmatprep.subr.bf16.mxu0 %v191_v6  ;;  %p274_p13 = por %p273_p12, %p272_p11 }
  0x3d   :  { %p275_p0 = pnand %p274_p13, %p268_p10 }
  0x3e   :  { %194 = vmatpush3.bf16.msra.mxu0 %v191_v6 }
  0x41   :  { %185 = vmatmul.mubr.msk.f32.vlgmr.msra.gmra.mrb[0].mxu0 %vm65_vm0, %v56_v7 }
 0x114   :  { %v186_v9 = vpop.f32.mrb[0].mxu0 }
 0x115   :  { %v144_v10 = vadd.f32 %v186_v9, %v167_v8  ;;  %v138_v11 = vpop.f32.mrb[1].mxu0 }
 0x116   :  { %v139_v12 = vadd.f32 %v167_v8, %v138_v11 }
 0x117   :  { %148 = vst.msk [vmem:[#allocation8 + $0x8] sm:$0xff] %vm65_vm0, %v144_v10 }
 0x118   :  { %147 = vst.msk [vmem:[#allocation8] sm:$0xff] %vm65_vm0, %v139_v12 }
 0x119   :  { %278 = shalt.err (!%p275_p0)
}
 0x11a   :  { %s279_s27 = scalar_lea.hbm %s392_s3, 256 }
 0x11b   :  { %p280_p1 = scmp.ne.s32.totalorder %s392_s3, %s279_s27  ;;  %p283_p2 = scmp.lt.u32.totalorder %s279_s27, %s392_s3 }
 0x11d   :  { %p285_p3 = pnand %p283_p2, %p280_p1 }
 0x11f   :  { %288 = shalt.err (!%p285_p3)
}
 0x120   :  { %160 = dma.vmem_to_hbm [thread:$0]  %s155_s21, 256, %s392_s3, [#allocation4], %s297_s24, %s297_s24, %s298_s25  }
 0x121   :  { %293 = dma.done.wait [#allocation4], 256  }
 0x122   :  { %294 = vsyncadd [#allocation4], 4294967040 }
 0x123   :  { %164 = vsyncpa [#allocation3], 1 }
 0x124   :  { %165 = vsyncpa [#allocation6], 1 }
 0x125   :  { %166 = vsyncpa [#allocation4], 1 }

</bundles_post_ra>
